<compile_context>
chip_gen: v7x
topology: tpu7x:2x2x1
jax: 0.10.0
libtpu: 0.0.40
codegen_flags: <defaults>
</compile_context>

<pallas_src>
import functools

import jax
import jax.numpy as jnp
from jax.experimental import pallas as pl
from jax.experimental.pallas import tpu as pltpu


_LANE = 128
# Conservative per-kernel VMEM budget for tile sizing.  Sized for v7x
# (64 MiB physical / 32 MiB default scoped); always safe on v5e/v6e (128 MiB).
_VMEM_BUDGET = 24 * 1024 * 1024
_VMEM_LIMIT_BYTES = 48 * 1024 * 1024


def _round_up(x, m):
    return (x + m - 1) // m * m


def _embedding_kernel(idx_ref, embT_ref, out_ref, acc_ref):
    """One (batch, token-tile, vocab-tile) grid step.

    idx_ref : (1, C, TN) int32 token indices (only channel 0 is read)
    embT_ref: (E, TV)    table slice, transposed (TV == V_pad when untiled)
    out_ref : (1, E, TN) channel-first embedded output (lane-dense over tokens)
    acc_ref : (E, TN)    f32 accumulator across the vocab-tile reduction axis
    """
    v_step = pl.program_id(2)

    @pl.when(v_step == 0)
    def _():
        acc_ref[...] = jnp.zeros_like(acc_ref)

    idx_full = idx_ref[0]                 # (C, TN) int32
    idx = idx_full[0:1, :]                # (1, TN): channel 0 only
    tv = embT_ref.shape[1]
    tn = idx.shape[1]

    # Global vocab row covered by sublane r of this vocab tile is v_step*tv + r.
    iota_v = jax.lax.broadcasted_iota(jnp.int32, (tv, tn), 0) + v_step * tv
    onehot = (iota_v == idx).astype(embT_ref.dtype)       # (TV, TN) exact 0/1
    # (E, TV) @ (TV, TN) -> (E, TN): embedding gather on the MXU, f32 accum.
    acc_ref[...] += jnp.dot(embT_ref[...], onehot,
                            preferred_element_type=jnp.float32)

    @pl.when(v_step == pl.num_programs(2) - 1)
    def _():
        out_ref[0] = acc_ref[...].astype(out_ref.dtype)


def prepare_table(emb_table, table_dtype=jnp.float32):
    """One-time prep of the (V, E) table -> transposed (E, V_pad), V_pad%128==0.

    Padding rows are zero; valid indices never hit them.  bf16 halves VMEM and
    is MXU-native on v5e (one-hot stays exact; table values round to bf16).
    """
    V, E = emb_table.shape
    embT = jnp.asarray(emb_table, table_dtype).T           # (E, V)
    v_pad = _round_up(V, _LANE)
    if v_pad != V:
        embT = jnp.pad(embT, ((0, 0), (0, v_pad - V)))
    return embT


def _vmem_bytes(E, tv, tn, table_itemsize):
    # Worst case: pipeliner double-buffers every block; temps in f32.
    table = 2 * E * tv * table_itemsize          # (E, TV) table block x2
    idx = 2 * 8 * tn * 4                         # (1, C, TN) index block x2 (C<=8 est.)
    out = 2 * E * tn * 4                         # (1, E, TN) output block x2
    acc = E * tn * 4                             # accumulator scratch
    onehot = tv * tn * table_itemsize            # one-hot temporary
    iota = tv * tn * 4                           # iota / compare temporary
    return table + idx + out + acc + onehot + iota


def _choose_tiles(B, N, E, Vp, table_itemsize, token_tile, vocab_tile):
    """Pick (token_tile, vocab_tile) under the VMEM budget."""
    n_pad = _round_up(N, _LANE)

    if token_tile is not None:
        assert token_tile % _LANE == 0
        tn_candidates = [token_tile]
    else:
        tn_candidates = [t for t in (2048, 1024, 512, 256, 128)
                         if n_pad % t == 0] or [_LANE]

    if vocab_tile is not None:
        assert vocab_tile == Vp or (vocab_tile % _LANE == 0 and Vp % vocab_tile == 0)
        tv_candidates = [vocab_tile]
    else:
        tv_candidates = [Vp] + [t for t in (2048, 1024, 512, 256)
                                if t < Vp and Vp % t == 0]
        if Vp > _LANE and Vp % _LANE == 0:
            tv_candidates.append(_LANE)

    max_par_steps = B * (n_pad // _LANE)
    for tn in tn_candidates:
        # Keep >= 2 parallel grid steps when possible (v7x has 2 TensorCores).
        if token_tile is None and max_par_steps >= 2 and B * (n_pad // tn) < 2:
            continue
        for tv in tv_candidates:
            if _vmem_bytes(E, tv, tn, table_itemsize) <= _VMEM_BUDGET:
                return tn, tv

    # Fallback: smallest tiles.
    fallback_tv = vocab_tile if vocab_tile is not None else (
        _LANE if (Vp > _LANE and Vp % _LANE == 0) else Vp)
    return _LANE, fallback_tv


def prepare_input_pallas(x, embT, *, token_tile=None, vocab_tile=None):
    """Pallas version of EmbeddingWrapper.prepare_input.

    x    : [B, C, D, H, W] integer indices (only channel 0 is used)
    embT : [E, V_pad] table, already transposed/cast/padded (see prepare_table)
    returns [B, E, D, H, W] float32
    """
    assert x.ndim == 5
    B, C, D, H, W = x.shape
    E, Vp = embT.shape
    N = D * H * W

    tn, tv = _choose_tiles(B, N, E, Vp, embT.dtype.itemsize,
                           token_tile, vocab_tile)
    n_pad = _round_up(N, tn)

    # Free reshape; channel 0 is selected inside the kernel (no HBM slice copy).
    idx = x.reshape(B, C, N).astype(jnp.int32)
    if n_pad != N:
        # Ragged tail: pad indices with 0 (a valid row); padded output columns
        # are dropped below.
        idx = jnp.pad(idx, ((0, 0), (0, 0), (0, n_pad - N)))

    grid = (B, n_pad // tn, Vp // tv)

    out = pl.pallas_call(
        _embedding_kernel,
        out_shape=jax.ShapeDtypeStruct((B, E, n_pad), jnp.float32),
        grid_spec=pltpu.PrefetchScalarGridSpec(
            num_scalar_prefetch=0,
            grid=grid,
            in_specs=[
                pl.BlockSpec((1, C, tn), lambda b, n, v: (b, 0, n)),
                pl.BlockSpec((E, tv), lambda b, n, v: (0, v)),
            ],
            out_specs=pl.BlockSpec((1, E, tn), lambda b, n, v: (b, 0, n)),
            scratch_shapes=[pltpu.VMEM((E, tn), jnp.float32)],
        ),
        compiler_params=pltpu.CompilerParams(
            dimension_semantics=("parallel", "parallel", "arbitrary"),
            vmem_limit_bytes=_VMEM_LIMIT_BYTES),
    )(idx, embT)

    if n_pad != N:
        out = out[:, :, :N]
    return out.reshape(B, E, D, H, W)


class EmbeddingWrapperPallas:
    """JAX/Pallas port of EmbeddingWrapper (embedding front-end only)."""

    def __init__(self, vocabulary_size, embedding_dim, key,
                 table_dtype=jnp.float32, token_tile=None, vocab_tile=None):
        # nn.Embedding default init: N(0, 1)
        self.embedding_dim = embedding_dim
        self.vocabulary_size = vocabulary_size
        self.emb_table = jax.random.normal(
            key, (vocabulary_size, embedding_dim), dtype=jnp.float32)
        # Transpose/cast/pad once; avoids a full table HBM pass per call.
        self._embT = prepare_table(self.emb_table, table_dtype)
        self._prepare = jax.jit(functools.partial(
            prepare_input_pallas, token_tile=token_tile, vocab_tile=vocab_tile))

    def prepare_input(self, x):
        original_shape = x.shape
        assert len(original_shape) == 5
        out = self._prepare(x, self._embT)
        assert original_shape[0] == out.shape[0]
        assert out.shape[1] == self.embedding_dim
        assert original_shape[2] == out.shape[2]
        assert original_shape[3] == out.shape[3]
        assert original_shape[4] == out.shape[4]
        return out

    def forward(self, x):
        x_emb = self.prepare_input(x)
        # TODO(synk): self.autoencoder(x_emb) — base AutoencoderKL not defined.
        return x_emb


if __name__ == "__main__":
    key = jax.random.PRNGKey(0)
    k_idx, k_emb, k_emb2 = jax.random.split(key, 3)

    # Small shapes consistent with the 5-D (B, C, D, H, W) forward.
    B, C, D, H, W = 2, 2, 8, 8, 8
    VOCAB, EMB = 64, 32

    x = jax.random.randint(k_idx, (B, C, D, H, W), 0, VOCAB, dtype=jnp.int32)

    # Path 1: full table resident in VMEM (single vocab tile), f32 table —
    # exact parity with nn.Embedding semantics.
    model = EmbeddingWrapperPallas(VOCAB, EMB, k_emb)
    out = jax.block_until_ready(model.forward(x))
    ref = jnp.moveaxis(model.emb_table[x[:, 0]], -1, 1)
    assert out.shape == (B, EMB, D, H, W)
    assert jnp.allclose(out, ref, atol=1e-5), "mismatch vs reference (full table)"

    # Path 2: larger vocabulary with forced vocab tiling (reduction grid axis)
    # and a bf16 table (v5e-friendly, halves table VMEM).  Reference is the
    # bf16-rounded table gather (one-hot itself is exact in bf16).
    VOCAB2 = 256
    x2 = jax.random.randint(k_idx, (B, C, D, H, W), 0, VOCAB2, dtype=jnp.int32)
    model2 = EmbeddingWrapperPallas(VOCAB2, EMB, k_emb2,
                                    table_dtype=jnp.bfloat16, vocab_tile=128)
    out2 = jax.block_until_ready(model2.forward(x2))
    ref2 = jnp.moveaxis(
        model2.emb_table.astype(jnp.bfloat16).astype(jnp.float32)[x2[:, 0]],
        -1, 1)
    assert out2.shape == (B, EMB, D, H, W)
    assert jnp.allclose(out2, ref2, atol=1e-5), \
        "mismatch vs reference (tiled vocab, bf16 table)"

    print("KERNEL_OK")
</pallas_src>

<mosaic_0001>
module attributes {stable_mosaic.version = 11 : i64} {
  func.func @_embedding_kernel(%arg0: i32, %arg1: i32, %arg2: i32, %arg3: memref<1x2x512xi32, #tpu.memory_space<vmem>>, %arg4: memref<32x128xf32, #tpu.memory_space<vmem>>, %arg5: memref<1x32x512xf32, #tpu.memory_space<vmem>>, %arg6: memref<32x512xf32, #tpu.memory_space<vmem>>) attributes {dimension_semantics = [#tpu.dimension_semantics<parallel>, #tpu.dimension_semantics<parallel>, #tpu.dimension_semantics<arbitrary>], iteration_bounds = array<i64: 2, 1, 1>, scalar_prefetch = 0 : i64, scratch_operands = 1 : i64, tpu.core_type = #tpu.core_type<tc>, window_params = [{transform_indices = @transform_0, window_bounds = array<i64: 1, 2, 512>}, {transform_indices = @transform_1, window_bounds = array<i64: 32, 128>}, {transform_indices = @transform_2, window_bounds = array<i64: 1, 32, 512>}]} {
    %c0_i32 = arith.constant 0 : i32
    %0 = arith.cmpi eq, %arg2, %c0_i32 : i32
    %1 = arith.extui %0 : i1 to i32
    %c0_i32_0 = arith.constant 0 : i32
    %2 = arith.cmpi ne, %1, %c0_i32_0 : i32
    scf.if %2 {
      %cst_11 = arith.constant 0.000000e+00 : f32
      %22 = vector.broadcast %cst_11 : f32 to vector<32x512xf32>
      %c0_12 = arith.constant 0 : index
      %c0_13 = arith.constant 0 : index
      %23 = vector.load %arg6[%c0_12, %c0_13] : memref<32x512xf32, #tpu.memory_space<vmem>>, vector<32x512xf32>
      tpu.vector_store %arg6[%c0_12, %c0_13], %22 {strides = array<i32>} : memref<32x512xf32, #tpu.memory_space<vmem>>, vector<32x512xf32>,
    } else {
    }
    %c0 = arith.constant 0 : index
    %c0_1 = arith.constant 0 : index
    %c0_2 = arith.constant 0 : index
    %3 = vector.load %arg3[%c0, %c0_1, %c0_2] : memref<1x2x512xi32, #tpu.memory_space<vmem>>, vector<1x2x512xi32>
    %4 = vector.shape_cast %3 : vector<1x2x512xi32> to vector<2x512xi32>
    %5 = vector.extract_strided_slice %4 {offsets = [0, 0], sizes = [1, 512], strides = [1, 1]} : vector<2x512xi32> to vector<1x512xi32>
    %6 = tpu.iota {dimensions = array<i32: 0>} : vector<128x512xi32>
    %c128_i32 = arith.constant 128 : i32
    %7 = arith.muli %arg2, %c128_i32 : i32
    %8 = vector.broadcast %7 : i32 to vector<128x512xi32>
    %9 = arith.addi %6, %8 : vector<128x512xi32>
    %10 = vector.broadcast %5 : vector<1x512xi32> to vector<128x512xi32>
    %11 = arith.cmpi eq, %9, %10 : vector<128x512xi32>
    %12 = arith.extui %11 : vector<128x512xi1> to vector<128x512xi32>
    %13 = arith.sitofp %12 : vector<128x512xi32> to vector<128x512xf32>
    %c0_3 = arith.constant 0 : index
    %c0_4 = arith.constant 0 : index
    %14 = vector.load %arg6[%c0_3, %c0_4] : memref<32x512xf32, #tpu.memory_space<vmem>>, vector<32x512xf32>
    %c0_5 = arith.constant 0 : index
    %c0_6 = arith.constant 0 : index
    %15 = vector.load %arg4[%c0_5, %c0_6] : memref<32x128xf32, #tpu.memory_space<vmem>>, vector<32x128xf32>
    %cst = arith.constant dense<0.000000e+00> : vector<32x512xf32>
    %16 = tpu.matmul %15, %13, %cst {dimension_numbers = #tpu.dot_dimension_numbers<[1], [0], [0], [1], [0, 0, 1, 1], [], []>} : vector<32x128xf32>, vector<128x512xf32>, vector<32x512xf32> -> vector<32x512xf32>
    %17 = arith.addf %14, %16 : vector<32x512xf32>
    %c0_7 = arith.constant 0 : index
    %c0_8 = arith.constant 0 : index
    %18 = vector.load %arg6[%c0_7, %c0_8] : memref<32x512xf32, #tpu.memory_space<vmem>>, vector<32x512xf32>
    tpu.vector_store %arg6[%c0_7, %c0_8], %17 {strides = array<i32>} : memref<32x512xf32, #tpu.memory_space<vmem>>, vector<32x512xf32>,
    %c0_i32_9 = arith.constant 0 : i32
    %19 = arith.cmpi eq, %arg2, %c0_i32_9 : i32
    %20 = arith.extui %19 : i1 to i32
    %c0_i32_10 = arith.constant 0 : i32
    %21 = arith.cmpi ne, %20, %c0_i32_10 : i32
    scf.if %21 {
      %c0_11 = arith.constant 0 : index
      %c0_12 = arith.constant 0 : index
      %22 = vector.load %arg6[%c0_11, %c0_12] : memref<32x512xf32, #tpu.memory_space<vmem>>, vector<32x512xf32>
      %c0_13 = arith.constant 0 : index
      %c0_14 = arith.constant 0 : index
      %c0_15 = arith.constant 0 : index
      %23 = vector.load %arg5[%c0_13, %c0_14, %c0_15] : memref<1x32x512xf32, #tpu.memory_space<vmem>>, vector<1x32x512xf32>
      %24 = vector.shape_cast %23 : vector<1x32x512xf32> to vector<32x512xf32>
      %25 = vector.shape_cast %22 : vector<32x512xf32> to vector<1x32x512xf32>
      tpu.vector_store %arg5[%c0_13, %c0_14, %c0_15], %25 {strides = array<i32>} : memref<1x32x512xf32, #tpu.memory_space<vmem>>, vector<1x32x512xf32>,
    } else {
    }
    return
  }
  func.func @transform_0(%arg0: i32, %arg1: i32, %arg2: i32) -> (i32, i32, i32) {
    %c0_i32 = arith.constant 0 : i32
    %c0_i32_0 = arith.constant 0 : i32
    return %arg0, %c0_i32, %arg1 : i32, i32, i32
  }
  func.func @transform_1(%arg0: i32, %arg1: i32, %arg2: i32) -> (i32, i32) {
    %c0_i32 = arith.constant 0 : i32
    %c0_i32_0 = arith.constant 0 : i32
    return %c0_i32, %arg2 : i32, i32
  }
  func.func @transform_2(%arg0: i32, %arg1: i32, %arg2: i32) -> (i32, i32, i32) {
    %c0_i32 = arith.constant 0 : i32
    %c0_i32_0 = arith.constant 0 : i32
    return %arg0, %c0_i32, %arg1 : i32, i32, i32
  }
}

</mosaic_0001>

<bundles_post_ra>
// kernel: prepare_input_pallas.1
= control target key start
LH: loop header
LB: loop body
LE: loop exit
PB: predicated region body
PF: predicated region fallthrough
CT: control target
= control target key end

     0   :  { %s1130_s9 = smov 0   ;;  %s1132_s10 = smov 0   ;;  %s1334_s0 = inlined_call_operand.vmem [shape: s32[2,2,512], index: 0, kind: input, shape index: {}]   ;;  %s1335_s1 = inlined_call_operand.vmem [shape: f32[32,128], index: 1, kind: input, shape index: {}]   ;;  %s1336_s2 = inlined_call_operand.vmem [shape: f32[2,32,512], index: 2, kind: output, shape index: {}]  }
   0x1   :  { %s1134_s11 = smov 0  }
   0x2 LB: > { %s31_s12 = sadd.s32 1, %s1107_s10  ;;  %p862_p0 = scmp.ge.s32.totalorder %s1111_s11, 1  ;;  %s1111_s11 = sphi %s1134_s11, %s12_s11   ;;  %s1107_s10 = sphi %s1132_s10, %s1338_s10   ;;  %s1103_s9 = sphi %s1130_s9, %s1337_s9  }
   0x3   : > { %p33_p1 = scmp.ge.s32.totalorder %s31_s12, 2  ;;  %p149_p2 = scmp.lt.s32.totalorder %s1111_s11, 3 }
   0x5   : > { %s1340_s12 = smov (%p33_p1, %s31_s12), 0  ;;  %p150_p3 = pnand %p862_p0, %p149_p2 }
   0x6   : > { %p184_p4 = scmp.lt.s32.totalorder (!%p150_p3), %s1103_s9, 1  ;;  %v228_v0 = vlaneseq (!%p150_p3)  ;;  %v1113_v1 = vmov (!%p150_p3), 0.0   ;;  %v1114_v19 = vmov (!%p150_p3), 1.0|1.0   ;;  %v503_v32 = vld [vmem:[%s1335_s1] sm:$0xff] (!%p150_p3)  ;;  %v504_v33 = vld [vmem:[%s1335_s1 + $0x8] sm:$0xff] (!%p150_p3) }
   0x7   : > { %153 = sbr.rel (%p150_p3) target bundleno = 284 (0x11c), region = 28  ;;  %571 = vmatprep.mubr.f32.mxu0 (!%p150_p3), %v1113_v1  ;;  %660 = vmatprep.mubr.f32.mxu1 (!%p150_p3), %v1113_v1  ;;  %v505_v34 = vld [vmem:[%s1335_s1 + $0x10] sm:$0xff] (!%p150_p3)  ;;  %v506_v35 = vld [vmem:[%s1335_s1 + $0x18] sm:$0xff] (!%p150_p3) }
   0x8   : > { %v1152_v2 = vshrl.u32 (!%p150_p3), %v228_v0, 7 }
   0xa   : > { %v265_v3 = vsub.s32 (!%p150_p3), 0, %v1152_v2  ;;  %v269_v4 = vsub.s32 (!%p150_p3), 2, %v1152_v2  ;;  %v277_v5 = vsub.s32 (!%p150_p3), 6, %v1152_v2  ;;  %v273_v6 = vsub.s32 (!%p150_p3), 4, %v1152_v2 }
   0xb   : > { %v230_v8 = vadd.s32 (!%p150_p3), 8, %v1152_v2  ;;  %v231_v13 = vadd.s32 (!%p150_p3), 16, %v1152_v2  ;;  %v232_v14 = vadd.s32 (!%p150_p3), 24, %v1152_v2  ;;  %v233_v20 = vadd.s32 (!%p150_p3), 32, %v1152_v2 }
   0xc   : > { %v234_v21 = vadd.s32 (!%p150_p3), 40, %v1152_v2  ;;  %v235_v22 = vadd.s32 (!%p150_p3), 48, %v1152_v2  ;;  %v236_v23 = vadd.s32 (!%p150_p3), 56, %v1152_v2  ;;  %v237_v24 = vadd.s32 (!%p150_p3), 64, %v1152_v2 }
   0xd   : > { %v238_v25 = vadd.s32 (!%p150_p3), 72, %v1152_v2  ;;  %v239_v26 = vadd.s32 (!%p150_p3), 80, %v1152_v2  ;;  %v240_v27 = vadd.s32 (!%p150_p3), 88, %v1152_v2  ;;  %v241_v28 = vadd.s32 (!%p150_p3), 96, %v1152_v2 }
   0xe   : > { %s1342_s9 = smov (!%p184_p4, %s1103_s9), 1  ;;  %v242_v29 = vadd.s32 104, %v1152_v2  ;;  %v243_v30 = vadd.s32 112, %v1152_v2  ;;  %v244_v31 = vadd.s32 120, %v1152_v2 }
   0xf   : > { %s997_s13 = sshll.u32 %s1342_s9, 3  ;;  %s998_s25 = sshll.u32 %s1342_s9, 7 }
  0x10   : > { %s191_s16 = scalar_lea.vmem %s1334_s0, %s997_s13  ;;  %s1307_s28 = scalar_lea.vmem %s1336_s2, %s998_s25 }
  0x11   : > { %v227_v7 = vld [vmem:[%s191_s16] sm:$0xff] }
  0x12   : > { %v270_v9 = vrot.slane %v227_v7, %v269_v4  ;;  %v278_v10 = vrot.slane %v227_v7, %v277_v5  ;;  %v266_v11 = vrot.slane %v227_v7, %v265_v3  ;;  %v274_v12 = vrot.slane %v227_v7, %v273_v6 }
  0x14   : > { %v1165_v15 = vrot.slane %v270_v9, %v265_v3  ;;  %v1167_v16 = vrot.slane %v278_v10, %v265_v3  ;;  %v1169_v17 = vrot.slane %v266_v11, %v265_v3  ;;  %v1171_v18 = vrot.slane %v274_v12, %v265_v3 }
  0x16   : > { %vm296_vm0 = vcmp.eq.s32.totalorder %v1152_v2, %v1165_v15  ;;  %vm300_vm1 = vcmp.eq.s32.totalorder %v230_v8, %v1165_v15  ;;  %vm298_vm2 = vcmp.eq.s32.totalorder %v1152_v2, %v1167_v16  ;;  %vm302_vm3 = vcmp.eq.s32.totalorder %v230_v8, %v1167_v16 }
  0x17   : > { %vm999_vm4 = vmpackc.low %vm300_vm1, %vm296_vm0  ;;  %vm295_vm5 = vcmp.eq.s32.totalorder %v1152_v2, %v1169_v17  ;;  %vm299_vm6 = vcmp.eq.s32.totalorder %v230_v8, %v1169_v17  ;;  %vm297_vm7 = vcmp.eq.s32.totalorder %v1152_v2, %v1171_v18  ;;  %vm301_vm8 = vcmp.eq.s32.totalorder %v230_v8, %v1171_v18 }
  0x18   : > { %1000 = vmatprep.subr.msk.bf16.mxu0 %vm999_vm4, %v1114_v19  ;;  %vm1031_vm9 = vmpackc.low %vm302_vm3, %vm298_vm2  ;;  %vm304_vm10 = vcmp.eq.s32.totalorder %v231_v13, %v1165_v15  ;;  %vm308_vm11 = vcmp.eq.s32.totalorder %v232_v14, %v1165_v15  ;;  %vm306_vm13 = vcmp.eq.s32.totalorder %v231_v13, %v1167_v16  ;;  %vm310_vm14 = vcmp.eq.s32.totalorder %v232_v14, %v1167_v16 }
  0x19   : > { %1032 = vmatprep.subr.msk.bf16.mxu1 %vm1031_vm9, %v1114_v19  ;;  %vm1001_vm12 = vmpackc.low %vm299_vm6, %vm295_vm5  ;;  %vm303_vm0 = vcmp.eq.s32.totalorder %v231_v13, %v1169_v17  ;;  %vm307_vm1 = vcmp.eq.s32.totalorder %v232_v14, %v1169_v17  ;;  %vm305_vm3 = vcmp.eq.s32.totalorder %v231_v13, %v1171_v18  ;;  %vm309_vm4 = vcmp.eq.s32.totalorder %v232_v14, %v1171_v18 }
  0x1a   : > { %1002 = vmatpush1.bf16.msk.msra.mxu0 %vm1001_vm12, %v1114_v19  ;;  %vm1033_vm15 = vmpackc.low %vm301_vm8, %vm297_vm7  ;;  %vm312_vm6 = vcmp.eq.s32.totalorder %v233_v20, %v1165_v15  ;;  %vm316_vm9 = vcmp.eq.s32.totalorder %v234_v21, %v1165_v15  ;;  %vm314_vm8 = vcmp.eq.s32.totalorder %v233_v20, %v1167_v16  ;;  %vm311_vm12 = vcmp.eq.s32.totalorder %v233_v20, %v1169_v17 }
  0x1b   : > { %1034 = vmatpush1.bf16.msk.msra.mxu1 %vm1033_vm15, %v1114_v19  ;;  %vm1003_vm2 = vmpackc.low %vm308_vm11, %vm304_vm10  ;;  %vm318_vm10 = vcmp.eq.s32.totalorder %v234_v21, %v1167_v16  ;;  %vm313_vm15 = vcmp.eq.s32.totalorder %v233_v20, %v1171_v18 }
  0x1c   : > { %1004 = vmatprep.subr.msk.bf16.mxu0 %vm1003_vm2, %v1114_v19  ;;  %vm1035_vm5 = vmpackc.low %vm310_vm14, %vm306_vm13  ;;  %vm315_vm13 = vcmp.eq.s32.totalorder %v234_v21, %v1169_v17  ;;  %vm317_vm2 = vcmp.eq.s32.totalorder %v234_v21, %v1171_v18 }
  0x1d   : > { %1036 = vmatprep.subr.msk.bf16.mxu1 %vm1035_vm5, %v1114_v19  ;;  %vm1005_vm7 = vmpackc.low %vm307_vm1, %vm303_vm0  ;;  %vm320_vm1 = vcmp.eq.s32.totalorder %v235_v22, %v1165_v15  ;;  %vm324_vm5 = vcmp.eq.s32.totalorder %v236_v23, %v1165_v15 }
  0x1e   : > { %1006 = vmatpush1.bf16.msk.msra.mxu0 %vm1005_vm7, %v1114_v19  ;;  %vm1037_vm11 = vmpackc.low %vm309_vm4, %vm305_vm3  ;;  %vm322_vm4 = vcmp.eq.s32.totalorder %v235_v22, %v1167_v16  ;;  %vm319_vm7 = vcmp.eq.s32.totalorder %v235_v22, %v1169_v17 }
  0x1f   : > { %1038 = vmatpush1.bf16.msk.msra.mxu1 %vm1037_vm11, %v1114_v19  ;;  %vm1007_vm14 = vmpackc.low %vm316_vm9, %vm312_vm6  ;;  %vm326_vm6 = vcmp.eq.s32.totalorder %v236_v23, %v1167_v16  ;;  %vm321_vm11 = vcmp.eq.s32.totalorder %v235_v22, %v1171_v18 }
  0x20   : > { %1008 = vmatprep.subr.msk.bf16.mxu0 %vm1007_vm14, %v1114_v19  ;;  %vm1039_vm0 = vmpackc.low %vm318_vm10, %vm314_vm8  ;;  %vm323_vm8 = vcmp.eq.s32.totalorder %v236_v23, %v1169_v17  ;;  %vm325_vm14 = vcmp.eq.s32.totalorder %v236_v23, %v1171_v18 }
  0x21   : > { %1040 = vmatprep.subr.msk.bf16.mxu1 %vm1039_vm0, %v1114_v19  ;;  %vm1009_vm3 = vmpackc.low %vm315_vm13, %vm311_vm12  ;;  %vm328_vm13 = vcmp.eq.s32.totalorder %v237_v24, %v1165_v15  ;;  %vm332_vm0 = vcmp.eq.s32.totalorder %v238_v25, %v1165_v15 }
  0x22   : > { %1010 = vmatpush1.bf16.msk.msra.mxu0 %vm1009_vm3, %v1114_v19  ;;  %vm1041_vm9 = vmpackc.low %vm317_vm2, %vm313_vm15  ;;  %vm330_vm2 = vcmp.eq.s32.totalorder %v237_v24, %v1167_v16  ;;  %vm327_vm3 = vcmp.eq.s32.totalorder %v237_v24, %v1169_v17 }
  0x23   : > { %1042 = vmatpush1.bf16.msk.msra.mxu1 %vm1041_vm9, %v1114_v19  ;;  %vm1011_vm10 = vmpackc.low %vm324_vm5, %vm320_vm1  ;;  %vm334_vm1 = vcmp.eq.s32.totalorder %v238_v25, %v1167_v16  ;;  %vm329_vm9 = vcmp.eq.s32.totalorder %v237_v24, %v1171_v18 }
  0x24   : > { %1012 = vmatprep.subr.msk.bf16.mxu0 %vm1011_vm10, %v1114_v19  ;;  %vm1043_vm12 = vmpackc.low %vm326_vm6, %vm322_vm4  ;;  %vm331_vm4 = vcmp.eq.s32.totalorder %v238_v25, %v1169_v17  ;;  %vm333_vm10 = vcmp.eq.s32.totalorder %v238_v25, %v1171_v18 }
  0x25   : > { %1044 = vmatprep.subr.msk.bf16.mxu1 %vm1043_vm12, %v1114_v19  ;;  %vm1013_vm15 = vmpackc.low %vm323_vm8, %vm319_vm7  ;;  %vm336_vm8 = vcmp.eq.s32.totalorder %v239_v26, %v1165_v15  ;;  %vm340_vm12 = vcmp.eq.s32.totalorder %v240_v27, %v1165_v15 }
  0x26   : > { %1014 = vmatpush1.bf16.msk.msra.mxu0 %vm1013_vm15, %v1114_v19  ;;  %vm1045_vm5 = vmpackc.low %vm325_vm14, %vm321_vm11  ;;  %vm338_vm14 = vcmp.eq.s32.totalorder %v239_v26, %v1167_v16  ;;  %vm335_vm15 = vcmp.eq.s32.totalorder %v239_v26, %v1169_v17 }
  0x27   : > { %1046 = vmatpush1.bf16.msk.msra.mxu1 %vm1045_vm5, %v1114_v19  ;;  %vm1015_vm6 = vmpackc.low %vm332_vm0, %vm328_vm13  ;;  %vm342_vm13 = vcmp.eq.s32.totalorder %v240_v27, %v1167_v16  ;;  %vm337_vm5 = vcmp.eq.s32.totalorder %v239_v26, %v1171_v18 }
  0x28   : > { %1016 = vmatprep.subr.msk.bf16.mxu0 %vm1015_vm6, %v1114_v19  ;;  %vm1047_vm7 = vmpackc.low %vm334_vm1, %vm330_vm2  ;;  %vm339_vm2 = vcmp.eq.s32.totalorder %v240_v27, %v1169_v17  ;;  %vm341_vm6 = vcmp.eq.s32.totalorder %v240_v27, %v1171_v18 }
  0x29   : > { %1048 = vmatprep.subr.msk.bf16.mxu1 %vm1047_vm7, %v1114_v19  ;;  %vm1017_vm11 = vmpackc.low %vm331_vm4, %vm327_vm3  ;;  %vm344_vm4 = vcmp.eq.s32.totalorder %v241_v28, %v1165_v15  ;;  %vm348_vm7 = vcmp.eq.s32.totalorder %v242_v29, %v1165_v15 }
  0x2a   : > { %1018 = vmatpush1.bf16.msk.msra.mxu0 %vm1017_vm11, %v1114_v19  ;;  %vm1049_vm0 = vmpackc.low %vm333_vm10, %vm329_vm9  ;;  %vm346_vm10 = vcmp.eq.s32.totalorder %v241_v28, %v1167_v16  ;;  %vm343_vm11 = vcmp.eq.s32.totalorder %v241_v28, %v1169_v17 }
  0x2b   : > { %1050 = vmatpush1.bf16.msk.msra.mxu1 %vm1049_vm0, %v1114_v19  ;;  %vm1019_vm1 = vmpackc.low %vm340_vm12, %vm336_vm8  ;;  %vm350_vm8 = vcmp.eq.s32.totalorder %v242_v29, %v1167_v16  ;;  %vm345_vm0 = vcmp.eq.s32.totalorder %v241_v28, %v1171_v18 }
  0x2c   : > { %1020 = vmatprep.subr.msk.bf16.mxu0 %vm1019_vm1, %v1114_v19  ;;  %vm1051_vm3 = vmpackc.low %vm342_vm13, %vm338_vm14  ;;  %vm347_vm14 = vcmp.eq.s32.totalorder %v242_v29, %v1169_v17  ;;  %vm349_vm1 = vcmp.eq.s32.totalorder %v242_v29, %v1171_v18 }
  0x2d   : > { %1052 = vmatprep.subr.msk.bf16.mxu1 %vm1051_vm3, %v1114_v19  ;;  %vm1021_vm9 = vmpackc.low %vm339_vm2, %vm335_vm15  ;;  %vm352_vm2 = vcmp.eq.s32.totalorder %v243_v30, %v1165_v15  ;;  %vm356_vm3 = vcmp.eq.s32.totalorder %v244_v31, %v1165_v15 }
  0x2e   : > { %1022 = vmatpush1.bf16.msk.msra.mxu0 %vm1021_vm9, %v1114_v19  ;;  %vm1053_vm12 = vmpackc.low %vm341_vm6, %vm337_vm5  ;;  %vm354_vm6 = vcmp.eq.s32.totalorder %v243_v30, %v1167_v16  ;;  %vm358_vm9 = vcmp.eq.s32.totalorder %v244_v31, %v1167_v16 }
  0x2f   : > { %1054 = vmatpush1.bf16.msk.msra.mxu1 %vm1053_vm12, %v1114_v19  ;;  %vm1023_vm13 = vmpackc.low %vm348_vm7, %vm344_vm4  ;;  %vm351_vm7 = vcmp.eq.s32.totalorder %v243_v30, %v1169_v17  ;;  %vm355_vm12 = vcmp.eq.s32.totalorder %v244_v31, %v1169_v17 }
  0x30   : > { %1024 = vmatprep.subr.msk.bf16.mxu0 %vm1023_vm13, %v1114_v19  ;;  %vm1055_vm15 = vmpackc.low %vm350_vm8, %vm346_vm10  ;;  %vm353_vm8 = vcmp.eq.s32.totalorder %v243_v30, %v1171_v18  ;;  %vm357_vm13 = vcmp.eq.s32.totalorder %v244_v31, %v1171_v18 }
  0x31   : > { %1056 = vmatprep.subr.msk.bf16.mxu1 %vm1055_vm15, %v1114_v19  ;;  %vm1025_vm5 = vmpackc.low %vm347_vm14, %vm343_vm11 }
  0x32   : > { %1026 = vmatpush1.bf16.msk.msra.mxu0 %vm1025_vm5, %v1114_v19  ;;  %vm1057_vm4 = vmpackc.low %vm349_vm1, %vm345_vm0 }
  0x33   : > { %1058 = vmatpush1.bf16.msk.msra.mxu1 %vm1057_vm4, %v1114_v19  ;;  %vm1027_vm10 = vmpackc.low %vm356_vm3, %vm352_vm2 }
  0x34   : > { %1028 = vmatprep.subr.msk.bf16.mxu0 %vm1027_vm10, %v1114_v19  ;;  %vm1059_vm11 = vmpackc.low %vm358_vm9, %vm354_vm6 }
  0x35   : > { %1060 = vmatprep.subr.msk.bf16.mxu1 %vm1059_vm11, %v1114_v19  ;;  %vm1029_vm14 = vmpackc.low %vm355_vm12, %vm351_vm7 }
  0x36   : > { %1030 = vmatpush1.bf16.msk.msra.mxu0 %vm1029_vm14, %v1114_v19  ;;  %vm1061_vm0 = vmpackc.low %vm357_vm13, %vm353_vm8 }
  0x37   : > { %1062 = vmatpush1.bf16.msk.msra.mxu1 %vm1061_vm0, %v1114_v19 }
  0x39   : > { %572 = vmatmul.mubr.f32.vlgmr.msra.gmra.mrb[0].mxu0 %v503_v32 }
  0x3a   : > { %661 = vmatmul.mubr.f32.vlgmr.msra.gmra.mrb[0].mxu1 %v503_v32  ;;  %577 = vmatprep.mubr.f32.mxu0 %v1113_v1 }
  0x3b   : > { %666 = vmatprep.mubr.f32.mxu1 %v1113_v1 }
  0x3d   : > { %578 = vmatmul.mubr.f32.gmra.mrb[2].mxu0 %v504_v33 }
  0x3e   : > { %667 = vmatmul.mubr.f32.gmra.mrb[2].mxu1 %v504_v33  ;;  %583 = vmatprep.mubr.f32.mxu0 %v1113_v1 }
  0x3f   : > { %672 = vmatprep.mubr.f32.mxu1 %v1113_v1 }
  0x41   : > { %584 = vmatmul.mubr.f32.gmra.mrb[4].mxu0 %v505_v34 }
  0x42   : > { %673 = vmatmul.mubr.f32.gmra.mrb[4].mxu1 %v505_v34  ;;  %589 = vmatprep.mubr.f32.mxu0 %v1113_v1 }
  0x43   : > { %678 = vmatprep.mubr.f32.mxu1 %v1113_v1 }
  0x45   : > { %590 = vmatmul.mubr.f32.gmra.mrb[6].mxu0 %v506_v35 }
  0x46   : > { %679 = vmatmul.mubr.f32.gmra.mrb[6].mxu1 %v506_v35 }
 0x10c   : > { %v573_v36 = vpop.f32.mrb[0].mxu0 }
 0x10d   : > { %736 = vst [vmem:[%s1307_s28] sm:$0xff] %v573_v36  ;;  %v662_v37 = vpop.f32.mrb[0].mxu1  ;;  %v575_v38 = vpop.f32.mrb[1].mxu0 }
 0x10e   : > { %738 = vst [vmem:[%s1307_s28 + $0x10] sm:$0xff] %v662_v37  ;;  %737 = vst [vmem:[%s1307_s28 + $0x8] sm:$0xff] %v575_v38  ;;  %v664_v39 = vpop.f32.mrb[1].mxu1 }
 0x10f   : > { %739 = vst [vmem:[%s1307_s28 + $0x18] sm:$0xff] %v664_v39 }
 0x110   : > { %v579_v40 = vpop.f32.mrb[2].mxu0 }
 0x111   : > { %740 = vst [vmem:[%s1307_s28 + $0x20] sm:$0xff] %v579_v40  ;;  %v668_v41 = vpop.f32.mrb[2].mxu1  ;;  %v581_v42 = vpop.f32.mrb[3].mxu0 }
 0x112   : > { %742 = vst [vmem:[%s1307_s28 + $0x30] sm:$0xff] %v668_v41  ;;  %741 = vst [vmem:[%s1307_s28 + $0x28] sm:$0xff] %v581_v42  ;;  %v670_v43 = vpop.f32.mrb[3].mxu1 }
 0x113   : > { %743 = vst [vmem:[%s1307_s28 + $0x38] sm:$0xff] %v670_v43 }
 0x114   : > { %v585_v44 = vpop.f32.mrb[4].mxu0 }
 0x115   : > { %744 = vst [vmem:[%s1307_s28 + $0x40] sm:$0xff] %v585_v44  ;;  %v674_v45 = vpop.f32.mrb[4].mxu1  ;;  %v587_v46 = vpop.f32.mrb[5].mxu0 }
 0x116   : > { %746 = vst [vmem:[%s1307_s28 + $0x50] sm:$0xff] %v674_v45  ;;  %745 = vst [vmem:[%s1307_s28 + $0x48] sm:$0xff] %v587_v46  ;;  %v676_v47 = vpop.f32.mrb[5].mxu1 }
 0x117   : > { %747 = vst [vmem:[%s1307_s28 + $0x58] sm:$0xff] %v676_v47 }
 0x118   : > { %v591_v48 = vpop.f32.mrb[6].mxu0 }
 0x119   : > { %748 = vst [vmem:[%s1307_s28 + $0x60] sm:$0xff] %v591_v48  ;;  %v680_v49 = vpop.f32.mrb[6].mxu1  ;;  %v593_v50 = vpop.f32.mrb[7].mxu0 }
 0x11a   : > { %750 = vst [vmem:[%s1307_s28 + $0x70] sm:$0xff] %v680_v49  ;;  %749 = vst [vmem:[%s1307_s28 + $0x68] sm:$0xff] %v593_v50  ;;  %v682_v51 = vpop.f32.mrb[7].mxu1 }
 0x11b   : > { %751 = vst [vmem:[%s1307_s28 + $0x78] sm:$0xff] %v682_v51 }
 0x11c PF: > { %s12_s11 = sadd.s32 1, %s1111_s11   ;;  %s1337_s9 = smov %s1107_s10 }
 0x11d   : > { %p9_p5 = scmp.ge.s32.totalorder %s12_s11, 4   ;;  %s1338_s10 = smov %s1340_s12 }
 0x11f   :  { %11 = sbr.rel (!%p9_p5) target bundleno = 2 (0x2), region = 69 }

</bundles_post_ra>
